<compile_context>
chip_gen: v6e
topology: v6e:2x2x1
jax: 0.10.0
libtpu: 0.0.40
codegen_flags: <defaults>
</compile_context>

<pallas_src>
import jax
import jax.numpy as jnp
from jax.experimental import pallas as pl
from jax.experimental.pallas import tpu as pltpu


def _round_up(x, m):
    return ((x + m - 1) // m) * m


def _mlp_kernel(x_ref, w1_ref, b1_ref, w2_ref, b2_ref, o_ref):
    # First linear: x (tm, F) @ w1 (F, Hp) -> (tm, Hp).  Standard (K, N)
    # contraction; the MXU consumes w1 directly (no operand transpose).
    h = jnp.dot(x_ref[...], w1_ref[...], preferred_element_type=jnp.float32)
    h = jnp.maximum(h + b1_ref[...], 0.0)  # bias + ReLU on the VPU

    # Second linear: h (tm, Hp) @ w2 (Hp, Op) -> (tm, Op).
    o = jnp.dot(h.astype(w2_ref.dtype), w2_ref[...],
                preferred_element_type=jnp.float32)
    o_ref[...] = (o + b2_ref[...]).astype(o_ref.dtype)


def prepare_mlp_params(w1, b1, w2, b2, dtype=jnp.float32):
    """One-time parameter prep (do NOT call per forward step).

    Pads the hidden/output dims to multiples of 128 and pre-transposes the
    PyTorch-layout (out_features, in_features) weights to (K, N) layout.
    w1: (H, F), b1: (H,), w2: (O, H), b2: (O,).
    """
    H, F = w1.shape
    O = w2.shape[0]
    Hp = _round_up(H, 128)   # lane-dense hidden width
    Op = _round_up(O, 128)   # lane-dense output width

    w1p = jnp.zeros((F, Hp), dtype).at[:, :H].set(w1.T.astype(dtype))
    b1p = jnp.zeros((1, Hp), dtype).at[0, :H].set(b1.astype(dtype))
    w2p = jnp.zeros((Hp, Op), dtype).at[:H, :O].set(w2.T.astype(dtype))
    b2p = jnp.zeros((1, Op), dtype).at[0, :O].set(b2.astype(dtype))
    return {"w1": w1p, "b1": b1p, "w2": w2p, "b2": b2p, "out_dim": O}


def mlp_forward(x, params, *, block_m=256):
    """x: (B, F); params from prepare_mlp_params() -> (B, O)."""
    w1p, b1p, w2p, b2p = params["w1"], params["b1"], params["w2"], params["b2"]
    O = params["out_dim"]

    B, F = x.shape
    Fp, Hp = w1p.shape
    assert Fp == F, "input feature dim mismatch with prepared params"
    Op = w2p.shape[1]

    # Batch tile: always a multiple of 8 sublanes, capped at (8-aligned) block_m.
    # For small B (e.g. the demo's 16) this yields a single grid step.
    tm = min(_round_up(B, 8), _round_up(block_m, 8))
    Bp = _round_up(B, tm)
    if Bp != B:
        x = jnp.zeros((Bp, F), x.dtype).at[:B, :].set(x)

    grid = (Bp // tm,)

    # Explicit VMEM budget: double-buffered x/out tiles + resident params.
    itemsize = jnp.dtype(x.dtype).itemsize
    resident = (F * Hp + Hp + Hp * Op + Op) * itemsize
    per_step = (tm * F + tm * Op) * itemsize
    vmem_limit = min(max(2 * (resident + per_step) + (4 << 20), 16 << 20), 64 << 20)

    out = pl.pallas_call(
        _mlp_kernel,
        out_shape=jax.ShapeDtypeStruct((Bp, Op), x.dtype),
        grid_spec=pl.GridSpec(
            grid=grid,
            in_specs=[
                pl.BlockSpec((tm, F), lambda i: (i, 0)),    # x: tiled over batch
                pl.BlockSpec((F, Hp), lambda i: (0, 0)),    # w1: VMEM-resident
                pl.BlockSpec((1, Hp), lambda i: (0, 0)),    # b1: VMEM-resident
                pl.BlockSpec((Hp, Op), lambda i: (0, 0)),   # w2: VMEM-resident
                pl.BlockSpec((1, Op), lambda i: (0, 0)),    # b2: VMEM-resident
            ],
            out_specs=pl.BlockSpec((tm, Op), lambda i: (i, 0)),
        ),
        compiler_params=pltpu.CompilerParams(
            # Batch axis is independent -> shardable across v7x's 2 TCs,
            # neutral on v5e/v6e.
            dimension_semantics=("parallel",),
            vmem_limit_bytes=int(vmem_limit),
        ),
    )(x, w1p, b1p, w2p, b2p)

    # Slice away batch/output padding.
    return out[:B, :O]


if __name__ == "__main__":
    batch = 16
    input_dim = 32
    hidden_dim = 1000   # fixed by the nn.Sequential in the module
    output_dim = 10

    key = jax.random.PRNGKey(0)
    kx, kw1, kb1, kw2, kb2 = jax.random.split(key, 5)

    x = jax.random.normal(kx, (batch, input_dim), dtype=jnp.float32)
    # Deterministic synthetic parameters in PyTorch nn.Linear layout.
    w1 = jax.random.normal(kw1, (hidden_dim, input_dim), dtype=jnp.float32) * 0.1
    b1 = jax.random.normal(kb1, (hidden_dim,), dtype=jnp.float32) * 0.1
    w2 = jax.random.normal(kw2, (output_dim, hidden_dim), dtype=jnp.float32) * 0.1
    b2 = jax.random.normal(kb2, (output_dim,), dtype=jnp.float32) * 0.1

    # One-time parameter prep (padding + pre-transpose), amortized across calls.
    params = prepare_mlp_params(w1, b1, w2, b2)

    # B=16 -> tm=16, grid=(1,): a single grid step for the demo shape.
    out = mlp_forward(x, params)
    out = jax.block_until_ready(out)

    # Reference check (plain JAX).
    ref = jnp.maximum(x @ w1.T + b1, 0.0) @ w2.T + b2
    assert out.shape == (batch, output_dim)
    assert jnp.allclose(out, ref, atol=1e-4, rtol=1e-4), float(
        jnp.max(jnp.abs(out - ref)))

    print("KERNEL_OK")
</pallas_src>

<mosaic_0001>
module attributes {stable_mosaic.version = 11 : i64} {
  func.func @_mlp_kernel(%arg0: i32, %arg1: memref<16x32xf32, #tpu.memory_space<vmem>>, %arg2: memref<32x1024xf32, #tpu.memory_space<vmem>>, %arg3: memref<1x1024xf32, #tpu.memory_space<vmem>>, %arg4: memref<1024x128xf32, #tpu.memory_space<vmem>>, %arg5: memref<1x128xf32, #tpu.memory_space<vmem>>, %arg6: memref<16x128xf32, #tpu.memory_space<vmem>>) attributes {dimension_semantics = [#tpu.dimension_semantics<parallel>], iteration_bounds = array<i64: 1>, scalar_prefetch = 0 : i64, scratch_operands = 0 : i64, tpu.core_type = #tpu.core_type<tc>, window_params = [{transform_indices = @transform_0, window_bounds = array<i64: 16, 32>}, {pipeline_mode = #tpu.pipeline_mode<synchronous>, transform_indices = @transform_1, window_bounds = array<i64: 32, 1024>}, {pipeline_mode = #tpu.pipeline_mode<synchronous>, transform_indices = @transform_2, window_bounds = array<i64: 1, 1024>}, {pipeline_mode = #tpu.pipeline_mode<synchronous>, transform_indices = @transform_3, window_bounds = array<i64: 1024, 128>}, {pipeline_mode = #tpu.pipeline_mode<synchronous>, transform_indices = @transform_4, window_bounds = array<i64: 1, 128>}, {transform_indices = @transform_5, window_bounds = array<i64: 16, 128>}]} {
    %c0 = arith.constant 0 : index
    %c0_0 = arith.constant 0 : index
    %0 = vector.load %arg1[%c0, %c0_0] : memref<16x32xf32, #tpu.memory_space<vmem>>, vector<16x32xf32>
    %c0_1 = arith.constant 0 : index
    %c0_2 = arith.constant 0 : index
    %1 = vector.load %arg2[%c0_1, %c0_2] : memref<32x1024xf32, #tpu.memory_space<vmem>>, vector<32x1024xf32>
    %cst = arith.constant dense<0.000000e+00> : vector<16x1024xf32>
    %2 = tpu.matmul %0, %1, %cst {dimension_numbers = #tpu.dot_dimension_numbers<[1], [0], [0], [1], [0, 0, 1, 1], [], []>} : vector<16x32xf32>, vector<32x1024xf32>, vector<16x1024xf32> -> vector<16x1024xf32>
    %c0_3 = arith.constant 0 : index
    %c0_4 = arith.constant 0 : index
    %3 = vector.load %arg3[%c0_3, %c0_4] : memref<1x1024xf32, #tpu.memory_space<vmem>>, vector<1x1024xf32>
    %4 = vector.broadcast %3 : vector<1x1024xf32> to vector<16x1024xf32>
    %5 = arith.addf %2, %4 : vector<16x1024xf32>
    %cst_5 = arith.constant 0.000000e+00 : f32
    %6 = vector.broadcast %cst_5 : f32 to vector<16x1024xf32>
    %7 = arith.maximumf %5, %6 : vector<16x1024xf32>
    %c0_6 = arith.constant 0 : index
    %c0_7 = arith.constant 0 : index
    %8 = vector.load %arg4[%c0_6, %c0_7] : memref<1024x128xf32, #tpu.memory_space<vmem>>, vector<1024x128xf32>
    %cst_8 = arith.constant dense<0.000000e+00> : vector<16x128xf32>
    %9 = tpu.matmul %7, %8, %cst_8 {dimension_numbers = #tpu.dot_dimension_numbers<[1], [0], [0], [1], [0, 0, 1, 1], [], []>} : vector<16x1024xf32>, vector<1024x128xf32>, vector<16x128xf32> -> vector<16x128xf32>
    %c0_9 = arith.constant 0 : index
    %c0_10 = arith.constant 0 : index
    %10 = vector.load %arg5[%c0_9, %c0_10] : memref<1x128xf32, #tpu.memory_space<vmem>>, vector<1x128xf32>
    %11 = vector.broadcast %10 : vector<1x128xf32> to vector<16x128xf32>
    %12 = arith.addf %9, %11 : vector<16x128xf32>
    %c0_11 = arith.constant 0 : index
    %c0_12 = arith.constant 0 : index
    %13 = vector.load %arg6[%c0_11, %c0_12] : memref<16x128xf32, #tpu.memory_space<vmem>>, vector<16x128xf32>
    tpu.vector_store %arg6[%c0_11, %c0_12], %12 {strides = array<i32>} : memref<16x128xf32, #tpu.memory_space<vmem>>, vector<16x128xf32>,
    return
  }
  func.func @transform_0(%arg0: i32) -> (i32, i32) {
    %c0_i32 = arith.constant 0 : i32
    %c0_i32_0 = arith.constant 0 : i32
    return %arg0, %c0_i32 : i32, i32
  }
  func.func @transform_1(%arg0: i32) -> (i32, i32) {
    %c0_i32 = arith.constant 0 : i32
    %c0_i32_0 = arith.constant 0 : i32
    %c0_i32_1 = arith.constant 0 : i32
    return %c0_i32, %c0_i32_0 : i32, i32
  }
  func.func @transform_2(%arg0: i32) -> (i32, i32) {
    %c0_i32 = arith.constant 0 : i32
    %c0_i32_0 = arith.constant 0 : i32
    %c0_i32_1 = arith.constant 0 : i32
    return %c0_i32, %c0_i32_0 : i32, i32
  }
  func.func @transform_3(%arg0: i32) -> (i32, i32) {
    %c0_i32 = arith.constant 0 : i32
    %c0_i32_0 = arith.constant 0 : i32
    %c0_i32_1 = arith.constant 0 : i32
    return %c0_i32, %c0_i32_0 : i32, i32
  }
  func.func @transform_4(%arg0: i32) -> (i32, i32) {
    %c0_i32 = arith.constant 0 : i32
    %c0_i32_0 = arith.constant 0 : i32
    %c0_i32_1 = arith.constant 0 : i32
    return %c0_i32, %c0_i32_0 : i32, i32
  }
  func.func @transform_5(%arg0: i32) -> (i32, i32) {
    %c0_i32 = arith.constant 0 : i32
    %c0_i32_0 = arith.constant 0 : i32
    return %arg0, %c0_i32 : i32, i32
  }
}

</mosaic_0001>

<bundles_post_ra>
// kernel: tpu_custom_call.1
= control target key start
LH: loop header
LB: loop body
LE: loop exit
PB: predicated region body
PF: predicated region fallthrough
CT: control target
= control target key end

     0   :  { %10 = vsyncpa [#allocation3], 0  ;;  %s1341_s0 = inlined_call_operand.hbm [shape: f32[16,32], index: 0, kind: input, shape index: {}]   ;;  %s1342_s1 = inlined_call_operand.hbm [shape: f32[32,1024], index: 1, kind: input, shape index: {}]   ;;  %s1343_s2 = inlined_call_operand.hbm [shape: f32[1,1024], index: 2, kind: input, shape index: {}]   ;;  %s1344_s3 = inlined_call_operand.hbm [shape: f32[1024,128], index: 3, kind: input, shape index: {}]   ;;  %s1345_s4 = inlined_call_operand.vmem [shape: f32[1,128], index: 4, kind: input, shape index: {}]   ;;  %s1346_s5 = inlined_call_operand.hbm [shape: f32[16,128], index: 5, kind: output, shape index: {}]  }
   0x1   :  { %11 = vsyncpa [#allocation6], 0 }
   0x2   :  { %12 = vsyncpa [#allocation9], 0 }
   0x3   :  { %13 = vsyncpa [#allocation4], 0  ;;  %s1216_s18 = smov [#allocation5]  }
   0x4   :  { %s31_s19 = sshll.u32 %s1216_s18, 4  ;;  %s32_s19 = int_to_ptr.vmem [resolvable:$true] %s31_s19 }
   0x5   :  { %s1116_s20 = scalar_lea.vmem %s32_s19, 4096  ;;  %p1121_p1 = scmp.lt.s32.totalorder %s32_s19, %s32_s19 }
   0x6   :  { %p1117_p0 = scmp.ne.s32.totalorder %s32_s19, %s1116_s20  ;;  %p1122_p2 = scmp.lt.s32.totalorder %s1116_s20, %s1116_s20 }
   0x8   :  { %p1123_p3 = por %p1122_p2, %p1121_p1 }
   0xa   :  { %p1124_p4 = pnand %p1123_p3, %p1117_p0 }
   0xc   :  { %1127 = shalt.err (!%p1124_p4)
}
   0xd   :  { %s1217_s21 = smov 1024   ;;  %s1218_s22 = smov 64  }
   0xe   :  { %37 = dma.hbm_to_vmem [thread:$0]  %s1342_s1, 4096, %s32_s19, [#allocation6], %s1217_s21, %s1217_s21, %s1218_s22  }
   0xf   :  { %s1219_s25 = smov [#allocation2]  }
  0x10   :  { %s19_s26 = sshll.u32 %s1219_s25, 4  ;;  %s20_s26 = int_to_ptr.vmem [resolvable:$true] %s19_s26 }
  0x11   :  { %s1136_s27 = scalar_lea.vmem %s20_s26, 256  ;;  %p1141_p6 = scmp.lt.s32.totalorder %s20_s26, %s20_s26 }
  0x12   :  { %p1137_p5 = scmp.ne.s32.totalorder %s20_s26, %s1136_s27  ;;  %p1142_p7 = scmp.lt.s32.totalorder %s1136_s27, %s1136_s27 }
  0x14   :  { %p1143_p8 = por %p1142_p7, %p1141_p6 }
  0x16   :  { %p1144_p9 = pnand %p1143_p8, %p1137_p5 }
  0x18   :  { %1147 = shalt.err (!%p1144_p9)
}
  0x19   :  { %s1220_s28 = smov 128   ;;  %s1221_s29 = smov 8  }
  0x1a   :  { %25 = dma.hbm_to_vmem [thread:$0]  %s1341_s0, 256, %s20_s26, [#allocation3], %s1220_s28, %s1220_s28, %s1221_s29  }
  0x1b   :  { %s1222_s1 = smov [#allocation7]   ;;  %s1223_s8 = smov [#allocation8]  }
  0x1c   :  { %s44_s7 = sshll.u32 %s1222_s1, 4  ;;  %s53_s9 = sshll.u32 %s1223_s8, 4  ;;  %s45_s7 = int_to_ptr.vmem [resolvable:$true] %s44_s7  ;;  %s54_s9 = int_to_ptr.vmem [resolvable:$true] %s53_s9 }
  0x1d   :  { %s1156_s10 = scalar_lea.vmem %s45_s7, 128  ;;  %p1161_p11 = scmp.lt.s32.totalorder %s45_s7, %s45_s7 }
  0x1e   :  { %p1157_p10 = scmp.ne.s32.totalorder %s45_s7, %s1156_s10  ;;  %p1162_p12 = scmp.lt.s32.totalorder %s1156_s10, %s1156_s10 }
  0x20   :  { %p1163_p13 = por %p1162_p12, %p1161_p11 }
  0x22   :  { %p1164_p0 = pnand %p1163_p13, %p1157_p10 }
  0x24   :  { %1167 = shalt.err (!%p1164_p0)
}
  0x25   :  { %47 = dma.hbm_to_vmem [thread:$0]  %s1343_s2, 128, %s45_s7, [#allocation6]  }
  0x26   :  { %s1176_s13 = scalar_lea.vmem %s54_s9, 16384  ;;  %p1181_p2 = scmp.lt.s32.totalorder %s54_s9, %s54_s9 }
  0x27   :  { %p1177_p1 = scmp.ne.s32.totalorder %s54_s9, %s1176_s13  ;;  %p1182_p3 = scmp.lt.s32.totalorder %s1176_s13, %s1176_s13 }
  0x29   :  { %p1183_p4 = por %p1182_p3, %p1181_p2 }
  0x2b   :  { %p1184_p5 = pnand %p1183_p4, %p1177_p1 }
  0x2d   :  { %1187 = shalt.err (!%p1184_p5)
}
  0x2e   :  { %59 = dma.hbm_to_vmem [thread:$0]  %s1344_s3, 16384, %s54_s9, [#allocation9], %s1220_s28, %s1220_s28, %s1221_s29  }
  0x2f   :  { %1208 = dma.done.wait [#allocation3], 256  }
  0x30   :  { %1209 = vsyncadd [#allocation3], 4294967040 }
  0x31   :  { %1210 = dma.done.wait [#allocation6], 4224  }
  0x32   :  { %1211 = vsyncadd [#allocation6], 4294963072 }
  0x33   :  { %1212 = dma.done.wait [#allocation9], 16384  }
  0x34   :  { %1213 = vsyncadd [#allocation9], 4294950912  ;;  %v1224_v0 = vmov 0.0   ;;  %v101_v1 = vld [vmem:[#allocation5 + $0xc8] sm:$0xff]  ;;  %v103_v2 = vld [vmem:[#allocation5 + $0xd8] sm:$0xff]  ;;  %vm150_vm0 = vcmask 261120  }
  0x35   :  { %221 = vmatprep.mubr.f32.mxu0 %v1224_v0  ;;  %298 = vmatprep.mubr.f32.mxu1 %v1224_v0  ;;  %v100_v3 = vld [vmem:[#allocation5 + $0xc0] sm:$0xff]  ;;  %v102_v4 = vld [vmem:[#allocation5 + $0xd0] sm:$0xff]  ;;  %v93_v5 = vld [vmem:[#allocation5 + $0x88] sm:$0xff] }
  0x36   :  { %181 = vmatprep.subr.mxu0 %v101_v1  ;;  %258 = vmatprep.subr.mxu1 %v103_v2  ;;  %v95_v6 = vld [vmem:[#allocation5 + $0x98] sm:$0xff]  ;;  %v92_v7 = vld [vmem:[#allocation5 + $0x80] sm:$0xff]  ;;  %v94_v8 = vld [vmem:[#allocation5 + $0x90] sm:$0xff] }
  0x37   :  { %182 = vmatpush1.msra.mxu0 %v100_v3  ;;  %259 = vmatpush1.msra.mxu1 %v102_v4  ;;  %v85_v9 = vld [vmem:[#allocation5 + $0x48] sm:$0xff]  ;;  %v87_v10 = vld [vmem:[#allocation5 + $0x58] sm:$0xff]  ;;  %v84_v11 = vld [vmem:[#allocation5 + $0x40] sm:$0xff] }
  0x38   :  { %183 = vmatprep.subr.mxu0 %v93_v5  ;;  %260 = vmatprep.subr.mxu1 %v95_v6  ;;  %v86_v12 = vld [vmem:[#allocation5 + $0x50] sm:$0xff]  ;;  %v77_v13 = vld [vmem:[#allocation5 + $0x8] sm:$0xff]  ;;  %v79_v14 = vld [vmem:[#allocation5 + $0x18] sm:$0xff] }
  0x39   :  { %184 = vmatpush1.msra.mxu0 %v92_v7  ;;  %261 = vmatpush1.msra.mxu1 %v94_v8  ;;  %v76_v15 = vld [vmem:[#allocation5] sm:$0xff]  ;;  %v78_v16 = vld [vmem:[#allocation5 + $0x10] sm:$0xff]  ;;  %v105_v18 = vld [vmem:[#allocation5 + $0xe8] sm:$0xff] }
  0x3a   :  { %185 = vmatprep.subr.mxu0 %v85_v9  ;;  %262 = vmatprep.subr.mxu1 %v87_v10  ;;  %v74_v17 = vld [vmem:[#allocation2] sm:$0xff]  ;;  %v104_v19 = vld [vmem:[#allocation5 + $0xe0] sm:$0xff]  ;;  %v97_v20 = vld [vmem:[#allocation5 + $0xa8] sm:$0xff] }
  0x3b   :  { %186 = vmatpush1.msra.mxu0 %v84_v11  ;;  %263 = vmatpush1.msra.mxu1 %v86_v12  ;;  %v107_v21 = vld [vmem:[#allocation5 + $0xf8] sm:$0xff]  ;;  %v96_v23 = vld [vmem:[#allocation5 + $0xa0] sm:$0xff]  ;;  %v106_v24 = vld [vmem:[#allocation5 + $0xf0] sm:$0xff] }
  0x3c   :  { %187 = vmatprep.subr.mxu0 %v77_v13  ;;  %264 = vmatprep.subr.mxu1 %v79_v14  ;;  %v75_v22 = vld [vmem:[#allocation2 + $0x8] sm:$0xff]  ;;  %v89_v25 = vld [vmem:[#allocation5 + $0x68] sm:$0xff]  ;;  %v88_v27 = vld [vmem:[#allocation5 + $0x60] sm:$0xff] }
  0x3d   :  { %188 = vmatpush1.msra.mxu0 %v76_v15  ;;  %265 = vmatpush1.msra.mxu1 %v78_v16  ;;  %v99_v26 = vld [vmem:[#allocation5 + $0xb8] sm:$0xff]  ;;  %v98_v28 = vld [vmem:[#allocation5 + $0xb0] sm:$0xff]  ;;  %v81_v29 = vld [vmem:[#allocation5 + $0x28] sm:$0xff] }
  0x3e   :  { %937 = vmatmul.mubr.msk.f32.vlgmr.msra.gmra.mxu0 %vm150_vm0, %v74_v17  ;;  %939 = vmatmul.mubr.msk.f32.vlgmr.msra.gmra.mxu1 %vm150_vm0, %v74_v17  ;;  %v91_v30 = vld [vmem:[#allocation5 + $0x78] sm:$0xff]  ;;  %v80_v31 = vld [vmem:[#allocation5 + $0x20] sm:$0xff]  ;;  %v90_v32 = vld [vmem:[#allocation5 + $0x70] sm:$0xff] }
  0x3f   :  { %227 = vmatprep.mubr.f32.mxu0 %v1224_v0  ;;  %335 = vmatprep.subr.mxu0 %v105_v18  ;;  %v83_v33 = vld [vmem:[#allocation5 + $0x38] sm:$0xff]  ;;  %v82_v34 = vld [vmem:[#allocation5 + $0x30] sm:$0xff]  ;;  %v512_v35 = vld [vmem:[#allocation8 + $0xf8] sm:$0xff] }
  0x40   :  { %336 = vmatpush1.msra.mxu0 %v104_v19  ;;  %304 = vmatprep.mubr.f32.mxu1 %v1224_v0  ;;  %v544_v36 = vld [vmem:[#allocation8 + $0x1f8] sm:$0xff]  ;;  %v511_v39 = vld [vmem:[#allocation8 + $0xf0] sm:$0xff]  ;;  %v510_v43 = vld [vmem:[#allocation8 + $0xe8] sm:$0xff] }
  0x41   :  { %337 = vmatprep.subr.mxu0 %v97_v20  ;;  %412 = vmatprep.subr.mxu1 %v107_v21  ;;  %v496_v37 = vld [vmem:[#allocation8 + $0x78] sm:$0xff]  ;;  %v543_v40 = vld [vmem:[#allocation8 + $0x1f0] sm:$0xff]  ;;  %v542_v44 = vld [vmem:[#allocation8 + $0x1e8] sm:$0xff] }
  0x42   :  { %938 = vmatmul.mubr.msk.f32.gmra.mxu0 %vm150_vm0, %v75_v22  ;;  %940 = vmatmul.mubr.msk.f32.gmra.mxu1 %vm150_vm0, %v75_v22  ;;  %v528_v38 = vld [vmem:[#allocation8 + $0x178] sm:$0xff]  ;;  %v495_v41 = vld [vmem:[#allocation8 + $0x70] sm:$0xff]  ;;  %v494_v45 = vld [vmem:[#allocation8 + $0x68] sm:$0xff] }
  0x43   :  { %338 = vmatpush1.msra.mxu0 %v96_v23  ;;  %413 = vmatpush1.msra.mxu1 %v106_v24  ;;  %v527_v42 = vld [vmem:[#allocation8 + $0x170] sm:$0xff]  ;;  %v526_v46 = vld [vmem:[#allocation8 + $0x168] sm:$0xff]  ;;  %v509_v47 = vld [vmem:[#allocation8 + $0xe0] sm:$0xff] }
  0x44   :  { %339 = vmatprep.subr.mxu0 %v89_v25  ;;  %414 = vmatprep.subr.mxu1 %v99_v26  ;;  %v541_v48 = vld [vmem:[#allocation8 + $0x1e0] sm:$0xff]  ;;  %v508_v51 = vld [vmem:[#allocation8 + $0xd8] sm:$0xff]  ;;  %v507_v55 = vld [vmem:[#allocation8 + $0xd0] sm:$0xff] }
  0x45   :  { %340 = vmatpush1.msra.mxu0 %v88_v27  ;;  %415 = vmatpush1.msra.mxu1 %v98_v28  ;;  %v493_v49 = vld [vmem:[#allocation8 + $0x60] sm:$0xff]  ;;  %v540_v52 = vld [vmem:[#allocation8 + $0x1d8] sm:$0xff]  ;;  %v539_v56 = vld [vmem:[#allocation8 + $0x1d0] sm:$0xff] }
  0x46   :  { %341 = vmatprep.subr.mxu0 %v81_v29  ;;  %416 = vmatprep.subr.mxu1 %v91_v30  ;;  %v525_v50 = vld [vmem:[#allocation8 + $0x160] sm:$0xff]  ;;  %v492_v53 = vld [vmem:[#allocation8 + $0x58] sm:$0xff]  ;;  %v491_v57 = vld [vmem:[#allocation8 + $0x50] sm:$0xff] }
  0x47   :  { %342 = vmatpush1.msra.mxu0 %v80_v31  ;;  %375 = vmatprep.mubr.f32.mxu0 %v1224_v0  ;;  %v524_v54 = vld [vmem:[#allocation8 + $0x158] sm:$0xff]  ;;  %v523_v58 = vld [vmem:[#allocation8 + $0x150] sm:$0xff]  ;;  %v506_v59 = vld [vmem:[#allocation8 + $0xc8] sm:$0xff] }
  0x48   :  { %417 = vmatpush1.msra.mxu1 %v90_v32  ;;  %941 = vmatmul.mubr.msk.f32.vlgmr.msra.gmra.mxu0 %vm150_vm0, %v74_v17  ;;  %v538_v60 = vld [vmem:[#allocation8 + $0x1c8] sm:$0xff]  ;;  %v505_v63 = vld [vmem:[#allocation8 + $0xc0] sm:$0xff]  ;;  %v504_v3 = vld [vmem:[#allocation8 + $0xb8] sm:$0xff] }
  0x49   :  { %418 = vmatprep.subr.mxu1 %v83_v33  ;;  %452 = vmatprep.mubr.f32.mxu1 %v1224_v0  ;;  %v490_v61 = vld [vmem:[#allocation8 + $0x48] sm:$0xff]  ;;  %v489_v1 = vld [vmem:[#allocation8 + $0x40] sm:$0xff]  ;;  %v536_v4 = vld [vmem:[#allocation8 + $0x1b8] sm:$0xff] }
  0x4a   :  { %419 = vmatpush1.msra.mxu1 %v82_v34  ;;  %381 = vmatprep.mubr.f32.mxu0 %v1224_v0  ;;  %v522_v62 = vld [vmem:[#allocation8 + $0x148] sm:$0xff]  ;;  %v521_v2 = vld [vmem:[#allocation8 + $0x140] sm:$0xff]  ;;  %v488_v5 = vld [vmem:[#allocation8 + $0x38] sm:$0xff] }
  0x4b   :  { %943 = vmatmul.mubr.msk.f32.vlgmr.msra.gmra.mxu1 %vm150_vm0, %v74_v17  ;;  %946 = vmatprep.subr.mxu0 %v512_v35  ;;  %v520_v6 = vld [vmem:[#allocation8 + $0x138] sm:$0xff]  ;;  %v503_v7 = vld [vmem:[#allocation8 + $0xb0] sm:$0xff]  ;;  %v502_v11 = vld [vmem:[#allocation8 + $0xa8] sm:$0xff] }
  0x4c   :  { %942 = vmatmul.mubr.msk.f32.gmra.mxu0 %vm150_vm0, %v75_v22  ;;  %458 = vmatprep.mubr.f32.mxu1 %v1224_v0  ;;  %v537_v0 = vld [vmem:[#allocation8 + $0x1c0] sm:$0xff]  ;;  %v535_v8 = vld [vmem:[#allocation8 + $0x1b0] sm:$0xff]  ;;  %v534_v12 = vld [vmem:[#allocation8 + $0x1a8] sm:$0xff] }
  0x4d   :  { %984 = vmatprep.subr.mxu1 %v544_v36  ;;  %947 = vmatpush3.msra.mxu0 %v496_v37  ;;  %v487_v9 = vld [vmem:[#allocation8 + $0x30] sm:$0xff]  ;;  %v486_v13 = vld [vmem:[#allocation8 + $0x28] sm:$0xff]  ;;  %v501_v15 = vld [vmem:[#allocation8 + $0xa0] sm:$0xff]  ;;  %v110_v37 = vlaneseq }
  0x4e   :  { %985 = vmatpush3.msra.mxu1 %v528_v38  ;;  %948 = vmatprep.subr.mxu0 %v511_v39  ;;  %v519_v10 = vld [vmem:[#allocation8 + $0x130] sm:$0xff]  ;;  %v518_v14 = vld [vmem:[#allocation8 + $0x128] sm:$0xff]  ;;  %v533_v16 = vld [vmem:[#allocation8 + $0x1a0] sm:$0xff] }
  0x4f   :  { %944 = vmatmul.mubr.msk.f32.gmra.mxu1 %vm150_vm0, %v75_v22  ;;  %986 = vmatprep.subr.mxu1 %v543_v40  ;;  %v485_v17 = vld [vmem:[#allocation8 + $0x20] sm:$0xff]  ;;  %v500_v19 = vld [vmem:[#allocation8 + $0x98] sm:$0xff]  ;;  %v499_v23 = vld [vmem:[#allocation8 + $0x90] sm:$0xff]  ;;  %v1290_v38 = vshrl.u32 %v110_v37, 7 }
  0x50   :  { %949 = vmatpush3.msra.mxu0 %v495_v41  ;;  %987 = vmatpush3.msra.mxu1 %v527_v42  ;;  %v517_v18 = vld [vmem:[#allocation8 + $0x120] sm:$0xff]  ;;  %v532_v20 = vld [vmem:[#allocation8 + $0x198] sm:$0xff]  ;;  %v531_v24 = vld [vmem:[#allocation8 + $0x190] sm:$0xff] }
  0x51   :  { %950 = vmatprep.subr.mxu0 %v510_v43  ;;  %988 = vmatprep.subr.mxu1 %v542_v44  ;;  %v484_v21 = vld [vmem:[#allocation8 + $0x18] sm:$0xff]  ;;  %v483_v25 = vld [vmem:[#allocation8 + $0x10] sm:$0xff]  ;;  %v498_v27 = vld [vmem:[#allocation8 + $0x88] sm:$0xff]  ;;  %v120_v39 = vsub.s32 2, %v1290_v38  ;;  %v112_v40 = vsub.s32 0, %v1290_v38  ;;  %v116_v42 = vsub.s32 1, %v1290_v38 }
  0x52   :  { %951 = vmatpush3.msra.mxu0 %v494_v45  ;;  %989 = vmatpush3.msra.mxu1 %v526_v46  ;;  %v516_v22 = vld [vmem:[#allocation8 + $0x118] sm:$0xff]  ;;  %v515_v26 = vld [vmem:[#allocation8 + $0x110] sm:$0xff]  ;;  %v530_v28 = vld [vmem:[#allocation8 + $0x188] sm:$0xff]  ;;  %v124_v43 = vsub.s32 3, %v1290_v38 }
  0x53   :  { %952 = vmatprep.subr.mxu0 %v509_v47  ;;  %990 = vmatprep.subr.mxu1 %v541_v48  ;;  %v482_v29 = vld [vmem:[#allocation8 + $0x8] sm:$0xff]  ;;  %v497_v31 = vld [vmem:[#allocation8 + $0x80] sm:$0xff]  ;;  %v576_v35 = vld [vmem:[#allocation8 + $0x2f8] sm:$0xff] }
  0x54   :  { %953 = vmatpush3.msra.mxu0 %v493_v49  ;;  %991 = vmatpush3.msra.mxu1 %v525_v50  ;;  %v514_v30 = vld [vmem:[#allocation8 + $0x108] sm:$0xff]  ;;  %v529_v32 = vld [vmem:[#allocation8 + $0x180] sm:$0xff]  ;;  %v608_v36 = vld [vmem:[#allocation8 + $0x3f8] sm:$0xff] }
  0x55   :  { %954 = vmatprep.subr.mxu0 %v508_v51  ;;  %992 = vmatprep.subr.mxu1 %v540_v52  ;;  %v481_v33 = vld [vmem:[#allocation8] sm:$0xff]  ;;  %v1294_v41 = vld [vmem:[#allocation7] sm:$0xff] }
  0x56   :  { %955 = vmatpush3.msra.mxu0 %v492_v53  ;;  %993 = vmatpush3.msra.mxu1 %v524_v54  ;;  %v513_v34 = vld [vmem:[#allocation8 + $0x100] sm:$0xff]  ;;  %v1299_v44 = vrot.slane %v1294_v41, %v120_v39  ;;  %v1302_v45 = vrot.slane %v1294_v41, %v112_v40  ;;  %v1305_v46 = vrot.slane %v1294_v41, %v116_v42  ;;  %v567_v39 = vld [vmem:[#allocation8 + $0x2b0] sm:$0xff]  ;;  %v132_v42 = vsub.s32 5, %v1290_v38 }
  0x57   :  { %956 = vmatprep.subr.mxu0 %v507_v55  ;;  %994 = vmatprep.subr.mxu1 %v539_v56  ;;  %v1308_v47 = vrot.slane %v1294_v41, %v124_v43  ;;  %v599_v40 = vld [vmem:[#allocation8 + $0x3b0] sm:$0xff] }
  0x58   :  { %957 = vmatpush3.msra.mxu0 %v491_v57  ;;  %995 = vmatpush3.msra.mxu1 %v523_v58  ;;  %v551_v43 = vld [vmem:[#allocation8 + $0x230] sm:$0xff] }
  0x59   :  { %958 = vmatprep.subr.mxu0 %v506_v59  ;;  %996 = vmatprep.subr.mxu1 %v538_v60  ;;  %v560_v60 = vld [vmem:[#allocation8 + $0x278] sm:$0xff] }
  0x5a   :  { %959 = vmatpush3.msra.mxu0 %v490_v61  ;;  %997 = vmatpush3.msra.mxu1 %v522_v62  ;;  %v592_v61 = vld [vmem:[#allocation8 + $0x378] sm:$0xff]  ;;  %v575_v62 = vld [vmem:[#allocation8 + $0x2f0] sm:$0xff] }
  0x5b   :  { %960 = vmatprep.subr.mxu0 %v505_v63  ;;  %998 = vmatprep.subr.mxu1 %v537_v0  ;;  %v607_v63 = vld [vmem:[#allocation8 + $0x3f0] sm:$0xff] }
  0x5c   :  { %961 = vmatpush3.msra.mxu0 %v489_v1  ;;  %999 = vmatpush3.msra.mxu1 %v521_v2  ;;  %v559_v0 = vld [vmem:[#allocation8 + $0x270] sm:$0xff]  ;;  %v574_v2 = vld [vmem:[#allocation8 + $0x2e8] sm:$0xff] }
  0x5d   :  { %962 = vmatprep.subr.mxu0 %v504_v3  ;;  %1000 = vmatprep.subr.mxu1 %v536_v4  ;;  %v591_v1 = vld [vmem:[#allocation8 + $0x370] sm:$0xff]  ;;  %v606_v3 = vld [vmem:[#allocation8 + $0x3e8] sm:$0xff] }
  0x5e   :  { %963 = vmatpush3.msra.mxu0 %v488_v5  ;;  %1001 = vmatpush3.msra.mxu1 %v520_v6  ;;  %v558_v4 = vld [vmem:[#allocation8 + $0x268] sm:$0xff]  ;;  %v573_v6 = vld [vmem:[#allocation8 + $0x2e0] sm:$0xff] }
  0x5f   :  { %964 = vmatprep.subr.mxu0 %v503_v7  ;;  %1002 = vmatprep.subr.mxu1 %v535_v8  ;;  %v590_v5 = vld [vmem:[#allocation8 + $0x368] sm:$0xff]  ;;  %v605_v7 = vld [vmem:[#allocation8 + $0x3e0] sm:$0xff] }
  0x60   :  { %965 = vmatpush3.msra.mxu0 %v487_v9  ;;  %1003 = vmatpush3.msra.mxu1 %v519_v10  ;;  %v557_v8 = vld [vmem:[#allocation8 + $0x260] sm:$0xff]  ;;  %v572_v10 = vld [vmem:[#allocation8 + $0x2d8] sm:$0xff] }
  0x61   :  { %966 = vmatprep.subr.mxu0 %v502_v11  ;;  %1004 = vmatprep.subr.mxu1 %v534_v12  ;;  %v589_v9 = vld [vmem:[#allocation8 + $0x360] sm:$0xff]  ;;  %v604_v11 = vld [vmem:[#allocation8 + $0x3d8] sm:$0xff] }
  0x62   :  { %967 = vmatpush3.msra.mxu0 %v486_v13  ;;  %1005 = vmatpush3.msra.mxu1 %v518_v14  ;;  %v556_v12 = vld [vmem:[#allocation8 + $0x258] sm:$0xff]  ;;  %v571_v14 = vld [vmem:[#allocation8 + $0x2d0] sm:$0xff] }
  0x63   :  { %968 = vmatprep.subr.mxu0 %v501_v15  ;;  %1006 = vmatprep.subr.mxu1 %v533_v16  ;;  %v588_v13 = vld [vmem:[#allocation8 + $0x358] sm:$0xff]  ;;  %v603_v15 = vld [vmem:[#allocation8 + $0x3d0] sm:$0xff] }
  0x64   :  { %969 = vmatpush3.msra.mxu0 %v485_v17  ;;  %1007 = vmatpush3.msra.mxu1 %v517_v18  ;;  %v555_v18 = vld [vmem:[#allocation8 + $0x250] sm:$0xff] }
  0x65   :  { %970 = vmatprep.subr.mxu0 %v500_v19  ;;  %1008 = vmatprep.subr.mxu1 %v532_v20  ;;  %v587_v19 = vld [vmem:[#allocation8 + $0x350] sm:$0xff]  ;;  %v570_v20 = vld [vmem:[#allocation8 + $0x2c8] sm:$0xff] }
  0x66   :  { %971 = vmatpush3.msra.mxu0 %v484_v21  ;;  %1009 = vmatpush3.msra.mxu1 %v516_v22  ;;  %v602_v21 = vld [vmem:[#allocation8 + $0x3c8] sm:$0xff] }
  0x67   :  { %972 = vmatprep.subr.mxu0 %v499_v23  ;;  %1010 = vmatprep.subr.mxu1 %v531_v24  ;;  %v554_v22 = vld [vmem:[#allocation8 + $0x248] sm:$0xff]  ;;  %v569_v24 = vld [vmem:[#allocation8 + $0x2c0] sm:$0xff] }
  0x68   :  { %973 = vmatpush3.msra.mxu0 %v483_v25  ;;  %1011 = vmatpush3.msra.mxu1 %v515_v26  ;;  %v586_v23 = vld [vmem:[#allocation8 + $0x348] sm:$0xff]  ;;  %v601_v25 = vld [vmem:[#allocation8 + $0x3c0] sm:$0xff] }
  0x69   :  { %974 = vmatprep.subr.mxu0 %v498_v27  ;;  %1012 = vmatprep.subr.mxu1 %v530_v28  ;;  %v553_v28 = vld [vmem:[#allocation8 + $0x240] sm:$0xff] }
  0x6a   :  { %975 = vmatpush3.msra.mxu0 %v482_v29  ;;  %1013 = vmatpush3.msra.mxu1 %v514_v30  ;;  %v585_v29 = vld [vmem:[#allocation8 + $0x340] sm:$0xff]  ;;  %v568_v30 = vld [vmem:[#allocation8 + $0x2b8] sm:$0xff] }
  0x6b   :  { %976 = vmatprep.subr.mxu0 %v497_v31  ;;  %1014 = vmatprep.subr.mxu1 %v529_v32  ;;  %v600_v31 = vld [vmem:[#allocation8 + $0x3b8] sm:$0xff] }
  0x6c   :  { %977 = vmatpush3.msra.mxu0 %v481_v33  ;;  %1015 = vmatpush3.msra.mxu1 %v513_v34 }
  0x6d   :  { %1022 = vmatprep.subr.mxu0 %v576_v35  ;;  %1060 = vmatprep.subr.mxu1 %v608_v36  ;;  %v552_v35 = vld [vmem:[#allocation8 + $0x238] sm:$0xff] }
  0x6e   :  { %v584_v36 = vld [vmem:[#allocation8 + $0x338] sm:$0xff] }
  0xfe   :  { %v223_v48 = vpop.f32.mrf.mxu0  ;;  %v300_v49 = vpop.f32.mrf.mxu1 }
  0xff   :  { %v301_v50 = vadd.f32 %v300_v49, %v1299_v44  ;;  %v224_v51 = vadd.f32 %v223_v48, %v1302_v45  ;;  %v583_v48 = vld [vmem:[#allocation8 + $0x330] sm:$0xff] }
 0x100   :  { %v225_v52 = vpop.f32.mrf.mxu0  ;;  %v302_v53 = vpop.f32.mrf.mxu1 }
 0x101   :  { %v226_v54 = vadd.f32 %v225_v52, %v1305_v46  ;;  %v303_v55 = vadd.f32 %v302_v53, %v1308_v47  ;;  %v467_v56 = vmax.f32 %v301_v50, 0.0  ;;  %v465_v59 = vmax.f32 %v224_v51, 0.0  ;;  %v566_v50 = vld [vmem:[#allocation8 + $0x2a8] sm:$0xff] }
 0x102   :  { %v229_v16 = vpop.f32.mrf.mxu0  ;;  %v306_v17 = vpop.f32.mrf.mxu1 }
 0x103   :  { %v466_v57 = vmax.f32 %v226_v54, 0.0  ;;  %v468_v58 = vmax.f32 %v303_v55, 0.0  ;;  %v230_v37 = vadd.f32 %v229_v16, %v1302_v45  ;;  %v307_v45 = vadd.f32 %v306_v17, %v1299_v44  ;;  %v550_v54 = vld [vmem:[#allocation8 + $0x228] sm:$0xff]  ;;  %v579_v16 = vld [vmem:[#allocation8 + $0x310] sm:$0xff] }
 0x104   :  { %v231_v26 = vpop.f32.mrf.mxu0  ;;  %v308_v27 = vpop.f32.mrf.mxu1  ;;  %v582_v55 = vld [vmem:[#allocation8 + $0x328] sm:$0xff]  ;;  %v128_v44 = vsub.s32 4, %v1290_v38 }
 0x105   :  { %680 = vmatprep.mubr.f32.mxu0 %v466_v57  ;;  %755 = vmatprep.mubr.f32.mxu1 %v468_v58  ;;  %v232_v34 = vadd.f32 %v231_v26, %v1305_v46  ;;  %v309_v49 = vadd.f32 %v308_v27, %v1308_v47  ;;  %v598_v46 = vld [vmem:[#allocation8 + $0x3a8] sm:$0xff]  ;;  %v473_v57 = vmax.f32 %v230_v37, 0.0  ;;  %v565_v58 = vld [vmem:[#allocation8 + $0x2a0] sm:$0xff]  ;;  %v136_v47 = vsub.s32 6, %v1290_v38 }
 0x106   :  { %681 = vmatmul.mubr.f32.vlgmr.msra.gmra.mxu0 %v465_v59  ;;  %756 = vmatmul.mubr.f32.vlgmr.msra.gmra.mxu1 %v467_v56  ;;  %v140_v56 = vsub.s32 7, %v1290_v38  ;;  %v133_v59 = vrot.slane %v1294_v41, %v132_v42  ;;  %v580_v38 = vld [vmem:[#allocation8 + $0x318] sm:$0xff]  ;;  %v593_v27 = vld [vmem:[#allocation8 + $0x380] sm:$0xff] }
 0x107   :  { %1023 = vmatpush3.msra.mxu0 %v560_v60  ;;  %1061 = vmatpush3.msra.mxu1 %v592_v61  ;;  %v474_v53 = vmax.f32 %v232_v34, 0.0  ;;  %v597_v60 = vld [vmem:[#allocation8 + $0x3a0] sm:$0xff]  ;;  %v476_v61 = vmax.f32 %v309_v49, 0.0 }
 0x108   :  { %1024 = vmatprep.subr.mxu0 %v575_v62  ;;  %1062 = vmatprep.subr.mxu1 %v607_v63  ;;  %v1314_v32 = vpop.f32.mrf.mxu0  ;;  %v549_v62 = vld [vmem:[#allocation8 + $0x220] sm:$0xff] }
 0x109   :  { %1025 = vmatpush3.msra.mxu0 %v559_v0  ;;  %1063 = vmatpush3.msra.mxu1 %v591_v1  ;;  %v581_v63 = vld [vmem:[#allocation8 + $0x320] sm:$0xff] }
 0x10a   :  { %1026 = vmatprep.subr.mxu0 %v574_v2  ;;  %1064 = vmatprep.subr.mxu1 %v606_v3  ;;  %v379_v51 = vpop.f32.mrf.mxu0  ;;  %v475_v2 = vmax.f32 %v307_v45, 0.0  ;;  %v564_v3 = vld [vmem:[#allocation8 + $0x298] sm:$0xff] }
 0x10b   :  { %1027 = vmatpush3.msra.mxu0 %v558_v4  ;;  %1065 = vmatpush3.msra.mxu1 %v590_v5  ;;  %v1316_v33 = vpop.f32.mrf.mxu1  ;;  %v141_v4 = vrot.slane %v1294_v41, %v140_v56  ;;  %v380_v5 = vadd.f32 %v379_v51, %v133_v59 }
 0x10c   :  { %1028 = vmatprep.subr.mxu0 %v573_v6  ;;  %1066 = vmatprep.subr.mxu1 %v605_v7  ;;  %v383_v0 = vpop.f32.mrf.mxu0  ;;  %v137_v6 = vrot.slane %v1294_v41, %v136_v47  ;;  %v596_v7 = vld [vmem:[#allocation8 + $0x398] sm:$0xff] }
 0x10d   :  { %1029 = vmatpush3.msra.mxu0 %v557_v8  ;;  %1067 = vmatpush3.msra.mxu1 %v589_v9  ;;  %v456_v52 = vpop.f32.mrf.mxu1  ;;  %v548_v8 = vld [vmem:[#allocation8 + $0x218] sm:$0xff]  ;;  %v129_v9 = vrot.slane %v1294_v41, %v128_v44  ;;  %v470_v17 = vmax.f32 %v380_v5, 0.0 }
 0x10e   :  { %1030 = vmatprep.subr.mxu0 %v572_v10  ;;  %1068 = vmatprep.subr.mxu1 %v604_v11  ;;  %v563_v10 = vld [vmem:[#allocation8 + $0x290] sm:$0xff] }
 0x10f   :  { %1031 = vmatpush3.msra.mxu0 %v556_v12  ;;  %1069 = vmatpush3.msra.mxu1 %v588_v13  ;;  %v460_v1 = vpop.f32.mrf.mxu1  ;;  %v595_v11 = vld [vmem:[#allocation8 + $0x390] sm:$0xff]  ;;  %v385_v12 = vpop.f32.mrf.mxu0 }
 0x110   :  { %1032 = vmatprep.subr.mxu0 %v571_v14  ;;  %1070 = vmatprep.subr.mxu1 %v603_v15  ;;  %v457_v14 = vadd.f32 %v456_v52, %v141_v4  ;;  %v547_v15 = vld [vmem:[#allocation8 + $0x210] sm:$0xff]  ;;  %v386_v41 = vadd.f32 %v385_v12, %v133_v59 }
 0x111   :  { %1033 = vmatpush3.msra.mxu0 %v555_v18  ;;  %1071 = vmatpush3.msra.mxu1 %v587_v19  ;;  %v462_v13 = vpop.f32.mrf.mxu1  ;;  %v455_v18 = vadd.f32 %v1316_v33, %v137_v6  ;;  %v562_v19 = vld [vmem:[#allocation8 + $0x288] sm:$0xff] }
 0x112   :  { %1034 = vmatprep.subr.mxu0 %v570_v20  ;;  %1072 = vmatprep.subr.mxu1 %v602_v21  ;;  %v594_v20 = vld [vmem:[#allocation8 + $0x388] sm:$0xff]  ;;  %v472_v26 = vmax.f32 %v457_v14, 0.0  ;;  %v478_v33 = vmax.f32 %v386_v41, 0.0 }
 0x113   :  { %1035 = vmatpush3.msra.mxu0 %v554_v22  ;;  %1073 = vmatpush3.msra.mxu1 %v586_v23  ;;  %v546_v21 = vld [vmem:[#allocation8 + $0x208] sm:$0xff]  ;;  %v463_v22 = vadd.f32 %v462_v13, %v141_v4  ;;  %v378_v23 = vadd.f32 %v1314_v32, %v129_v9  ;;  %v384_v32 = vadd.f32 %v383_v0, %v129_v9 }
 0x114   :  { %1036 = vmatprep.subr.mxu0 %v569_v24  ;;  %1074 = vmatprep.subr.mxu1 %v601_v25  ;;  %v578_v24 = vld [vmem:[#allocation8 + $0x308] sm:$0xff]  ;;  %v561_v25 = vld [vmem:[#allocation8 + $0x280] sm:$0xff] }
 0x115   :  { %1037 = vmatpush3.msra.mxu0 %v553_v28  ;;  %1075 = vmatpush3.msra.mxu1 %v585_v29  ;;  %v545_v28 = vld [vmem:[#allocation8 + $0x200] sm:$0xff]  ;;  %v471_v29 = vmax.f32 %v455_v18, 0.0  ;;  %v480_v34 = vmax.f32 %v463_v22, 0.0  ;;  %v477_v37 = vmax.f32 %v384_v32, 0.0 }
 0x116   :  { %1038 = vmatprep.subr.mxu0 %v568_v30  ;;  %1076 = vmatprep.subr.mxu1 %v600_v31  ;;  %v461_v30 = vadd.f32 %v460_v1, %v137_v6  ;;  %v577_v31 = vld [vmem:[#allocation8 + $0x300] sm:$0xff] }
 0x117   :  { %1039 = vmatpush3.msra.mxu0 %v552_v35  ;;  %1077 = vmatpush3.msra.mxu1 %v584_v36  ;;  %v469_v35 = vmax.f32 %v378_v23, 0.0 }
 0x118   :  { %1040 = vmatprep.subr.mxu0 %v567_v39  ;;  %1078 = vmatprep.subr.mxu1 %v599_v40  ;;  %v479_v36 = vmax.f32 %v461_v30, 0.0 }
 0x119   :  { %1041 = vmatpush3.msra.mxu0 %v551_v43  ;;  %1079 = vmatpush3.msra.mxu1 %v583_v48 }
 0x11a   :  { %1042 = vmatprep.subr.mxu0 %v566_v50  ;;  %1080 = vmatprep.subr.mxu1 %v598_v46  ;;  %v945_v46 = vld [vmem:[%s1345_s4] ss:$0 sm:$0xff]  ;;  %s1225_s4 = smov [#allocation10]  }
 0x11b   :  { %1043 = vmatpush3.msra.mxu0 %v550_v54  ;;  %1081 = vmatpush3.msra.mxu1 %v582_v55  ;;  %s923_s15 = sshll.u32 %s1225_s4, 4  ;;  %s924_s15 = int_to_ptr.vmem [resolvable:$true] %s923_s15 }
 0x11c   :  { %685 = vmatprep.mubr.f32.mxu0 %v474_v53  ;;  %1044 = vmatprep.subr.mxu0 %v565_v58  ;;  %s1188_s16 = scalar_lea.vmem %s924_s15, 256  ;;  %p1193_p7 = scmp.lt.s32.totalorder %s924_s15, %s924_s15 }
 0x11d   :  { %1082 = vmatprep.subr.mxu1 %v597_v60  ;;  %686 = vmatmul.mubr.f32.gmra.mxu0 %v473_v57  ;;  %p1189_p6 = scmp.ne.s32.totalorder %s924_s15, %s1188_s16  ;;  %p1194_p8 = scmp.lt.s32.totalorder %s1188_s16, %s1188_s16 }
 0x11e   :  { %1045 = vmatpush3.msra.mxu0 %v549_v62  ;;  %1083 = vmatpush3.msra.mxu1 %v581_v63 }
 0x11f   :  { %760 = vmatprep.mubr.f32.mxu1 %v476_v61  ;;  %1046 = vmatprep.subr.mxu0 %v564_v3  ;;  %p1195_p9 = por %p1194_p8, %p1193_p7 }
 0x120   :  { %1084 = vmatprep.subr.mxu1 %v596_v7  ;;  %761 = vmatmul.mubr.f32.gmra.mxu1 %v475_v2 }
 0x121   :  { %1047 = vmatpush3.msra.mxu0 %v548_v8  ;;  %1085 = vmatpush3.msra.mxu1 %v580_v38  ;;  %p1196_p10 = pnand %p1195_p9, %p1189_p6 }
 0x122   :  { %1048 = vmatprep.subr.mxu0 %v563_v10  ;;  %1086 = vmatprep.subr.mxu1 %v595_v11 }
 0x123   :  { %1049 = vmatpush3.msra.mxu0 %v547_v15  ;;  %1087 = vmatpush3.msra.mxu1 %v579_v16 }
 0x124   :  { %1050 = vmatprep.subr.mxu0 %v562_v19  ;;  %1088 = vmatprep.subr.mxu1 %v594_v20 }
 0x125   :  { %1051 = vmatpush3.msra.mxu0 %v546_v21  ;;  %830 = vmatprep.mubr.f32.mxu0 %v470_v17 }
 0x126   :  { %1089 = vmatpush3.msra.mxu1 %v578_v24  ;;  %1052 = vmatprep.subr.mxu0 %v561_v25 }
 0x127   :  { %1090 = vmatprep.subr.mxu1 %v593_v27  ;;  %1053 = vmatpush3.msra.mxu0 %v545_v28 }
 0x128   :  { %1091 = vmatpush3.msra.mxu1 %v577_v31  ;;  %905 = vmatprep.mubr.f32.mxu1 %v472_v26 }
 0x129   :  { %831 = vmatmul.mubr.f32.vlgmr.msra.gmra.mxu0 %v469_v35  ;;  %906 = vmatmul.mubr.f32.vlgmr.msra.gmra.mxu1 %v471_v29 }
 0x12a   :  { %835 = vmatprep.mubr.f32.mxu0 %v478_v33  ;;  %910 = vmatprep.mubr.f32.mxu1 %v480_v34 }
 0x12d   :  { %836 = vmatmul.mubr.f32.gmra.mxu0 %v477_v37  ;;  %911 = vmatmul.mubr.f32.gmra.mxu1 %v479_v36 }
 0x1c6   :  { %v978_v39 = vpop.f32.mrf.mxu0  ;;  %v1016_v40 = vpop.f32.mrf.mxu1 }
 0x1c8   :  { %v979_v42 = vpop.f32.mrf.mxu0  ;;  %v1017_v43 = vpop.f32.mrf.mxu1 }
 0x1c9   :  { %v980_v50 = vadd.f32 %v979_v42, %v978_v39  ;;  %v1018_v56 = vadd.f32 %v1017_v43, %v1016_v40 }
 0x1cb   :  { %v683_v53 = vadd.f32 %v980_v50, %v945_v46 }
 0x1cd   :  { %v758_v59 = vadd.f32 %v1018_v56, %v683_v53 }
 0x1dd   :  { %v981_v48 = vpop.f32.mrf.mxu0 }
 0x1df   :  { %v982_v51 = vpop.f32.mrf.mxu0 }
 0x1e0   :  { %v1019_v49 = vpop.f32.mrf.mxu1  ;;  %v983_v45 = vadd.f32 %v982_v51, %v981_v48 }
 0x1e2   :  { %v1020_v52 = vpop.f32.mrf.mxu1  ;;  %v688_v47 = vadd.f32 %v983_v45, %v945_v46 }
 0x1e3   :  { %v1021_v60 = vadd.f32 %v1020_v52, %v1019_v49 }
 0x1e5   :  { %v763_v3 = vadd.f32 %v1021_v60, %v688_v47 }
 0x1e9   :  { %v1054_v54 = vpop.f32.mrf.mxu0  ;;  %v1092_v55 = vpop.f32.mrf.mxu1 }
 0x1eb   :  { %v1055_v57 = vpop.f32.mrf.mxu0  ;;  %v1093_v58 = vpop.f32.mrf.mxu1 }
 0x1ec   :  { %v1056_v61 = vadd.f32 %v1055_v57, %v1054_v54  ;;  %v1094_v0 = vadd.f32 %v1093_v58, %v1092_v55 }
 0x1ed   :  { %v1057_v44 = vpop.f32.mrf.mxu0  ;;  %v1095_v62 = vpop.f32.mrf.mxu1 }
 0x1ee   :  { %v833_v63 = vadd.f32 %v1056_v61, %v758_v59 }
 0x1ef   :  { %v1058_v1 = vpop.f32.mrf.mxu0  ;;  %v1096_v2 = vpop.f32.mrf.mxu1 }
 0x1f0   :  { %v908_v4 = vadd.f32 %v1094_v0, %v833_v63  ;;  %v1059_v5 = vadd.f32 %v1058_v1, %v1057_v44  ;;  %v1097_v7 = vadd.f32 %v1096_v2, %v1095_v62 }
 0x1f2   :  { %916 = vst [vmem:[#allocation10] sm:$0xff] %v908_v4  ;;  %v838_v6 = vadd.f32 %v1059_v5, %v763_v3 }
 0x1f4   :  { %v913_v8 = vadd.f32 %v1097_v7, %v838_v6 }
 0x1f6   :  { %917 = vst [vmem:[#allocation10 + $0x8] sm:$0xff] %v913_v8 }
 0x1f7   :  { %1199 = shalt.err (!%p1196_p10)
}
 0x1f8   :  { %929 = dma.vmem_to_hbm [thread:$0]  %s924_s15, 256, %s1346_s5, [#allocation4], %s1220_s28, %s1220_s28, %s1221_s29  }
 0x1f9   :  { %1214 = dma.done.wait [#allocation4], 256  }
 0x1fa   :  { %1215 = vsyncadd [#allocation4], 4294967040 }
 0x1fb   :  { %933 = vsyncpa [#allocation3], 1 }
 0x1fc   :  { %934 = vsyncpa [#allocation6], 1 }
 0x1fd   :  { %935 = vsyncpa [#allocation9], 1 }
 0x1fe   :  { %936 = vsyncpa [#allocation4], 1 }

</bundles_post_ra>
